<compile_context>
chip_gen: v5e
topology: v5e:2x2
jax: 0.10.0
libtpu: 0.0.40
codegen_flags: <defaults>
</compile_context>

<pallas_src>
import functools

import jax
import jax.numpy as jnp
from jax.experimental import pallas as pl
from jax.experimental.pallas import tpu as pltpu


# ----------------------------------------------------------------------------
# gamma tonemap kernels:  rgb = (x / (x + 1)) ** gamma
# ----------------------------------------------------------------------------
def _gamma_kernel_static(x_ref, o_ref, *, gamma, approx):
    x = x_ref[...].astype(jnp.float32)
    if approx:
        # v7x option: keeps the kernel on the 3.2 TB/s HBM roofline.
        u = x * pl.reciprocal(x + 1.0, approx=True)
    else:
        u = x / (x + 1.0)
    # pow via one log + one exp on the EUP; +1e-30 keeps log finite at u == 0
    # (result underflows to exactly 0, matching torch's 0**gamma for gamma>0).
    o_ref[...] = jnp.exp(gamma * jnp.log(u + 1e-30)).astype(o_ref.dtype)


def _gamma_kernel_learned(gamma_ref, x_ref, o_ref, *, approx):
    g = gamma_ref[0]
    x = x_ref[...].astype(jnp.float32)
    if approx:
        u = x * pl.reciprocal(x + 1.0, approx=True)
    else:
        u = x / (x + 1.0)
    o_ref[...] = jnp.exp(g * jnp.log(u + 1e-30)).astype(o_ref.dtype)


def tonemap_gamma(rgb_hdr, gamma, block_rows=2048, approx_recip=False):
    """(x/(x+1))**gamma, pointwise.

    gamma: Python float/int -> baked in as a constant ('fixed-gamma');
           jnp array        -> 1-D SMEM scalar operand ('learned-gamma').
    block_rows=2048 -> 1 MiB/buffer; 4 MiB total with double buffering, safe
    under every generation's default scoped-VMEM limit (incl. v5e's 16 MiB).
    """
    orig_shape = rgb_hdr.shape
    orig_dtype = rgb_hdr.dtype
    flat = rgb_hdr.reshape(-1)
    total = flat.shape[0]
    lanes = 128
    main = (total // lanes) * lanes

    learned = not isinstance(gamma, (int, float))
    if learned:
        gamma_arr = jnp.asarray(gamma, jnp.float32).reshape(-1)[:1]  # (1,) SMEM

    def jnp_gamma(v):  # tiny-tail / tiny-input path (<=127 elements)
        g = gamma_arr[0] if learned else float(gamma)
        vf = v.astype(jnp.float32)
        u = vf / (vf + 1.0)
        return jnp.exp(g * jnp.log(u + 1e-30)).astype(orig_dtype)

    if main == 0:
        return jnp_gamma(flat).reshape(orig_shape)

    if main == total:
        x = flat.reshape(-1, lanes)            # free reshape, no extra HBM pass
    else:
        x = flat[:main].reshape(-1, lanes)     # only when total % 128 != 0
    m = x.shape[0]

    # >=2 grid steps when possible (v7x has 2 TensorCores); rows multiple of 8.
    if m > 8:
        br = min(block_rows, ((pl.cdiv(m, 2) + 7) // 8) * 8)
    else:
        br = m
    grid = (pl.cdiv(m, br),)
    blk = pl.BlockSpec((br, lanes), lambda i: (i, 0))

    if learned:
        kernel = functools.partial(_gamma_kernel_learned, approx=approx_recip)
        in_specs = [pl.BlockSpec(memory_space=pltpu.MemorySpace.SMEM), blk]
        args = (gamma_arr, x)
    else:
        kernel = functools.partial(_gamma_kernel_static, gamma=float(gamma),
                                   approx=approx_recip)
        in_specs = [blk]
        args = (x,)

    out = pl.pallas_call(
        kernel,
        out_shape=jax.ShapeDtypeStruct((m, lanes), orig_dtype),
        grid=grid,
        in_specs=in_specs,
        out_specs=pl.BlockSpec((br, lanes), lambda i: (i, 0)),
        compiler_params=pltpu.CompilerParams(dimension_semantics=("parallel",)),
    )(*args)

    out_flat = out.reshape(-1)
    if main != total:
        out_flat = jnp.concatenate([out_flat, jnp_gamma(flat[main:])])
    return out_flat.reshape(orig_shape)


# ----------------------------------------------------------------------------
# learned-mlp tonemap kernel: fused channel-major Linear/ReLU/.../Linear/Sigmoid
# ----------------------------------------------------------------------------
def _make_mlp_kernel(n_layers, sub_cols, compute_dtype):
    def kernel(*refs):
        x_ref = refs[0]
        o_ref = refs[-1]
        wb = refs[1:-1]
        tc = x_ref.shape[1]
        sub = sub_cols
        n_sub, rem = divmod(tc, sub)

        # Hoist the (small, resident) weight/bias loads out of the sub-tile loop.
        w_first = wb[0][...].astype(jnp.float32)                 # (d_out0, 3)
        b_first = wb[1][...]                                     # (d_out0, 1) f32
        if n_layers > 1:
            w_hidden = [wb[2 * l][...] for l in range(1, n_layers - 1)]       # compute_dtype
            b_hidden = [wb[2 * l + 1][...] for l in range(1, n_layers - 1)]   # f32 (d,1)
            w_last = wb[2 * (n_layers - 1)][...].astype(jnp.float32)          # (d_hidden, 3)
            b_last = wb[2 * (n_layers - 1) + 1][...]                          # (3, 1) f32

        def process(c0, width):
            x = x_ref[:, pl.ds(c0, width)].astype(jnp.float32)   # (3, width)
            # layer 0 (K=3): three broadcast FMAs on the VPU, exact f32.
            h = (w_first[:, 0:1] * x[0:1, :]
                 + w_first[:, 1:2] * x[1:2, :]
                 + w_first[:, 2:3] * x[2:3, :]) + b_first
            if n_layers == 1:
                z = h
            else:
                h = jnp.maximum(h, 0.0)                          # ReLU (VPU)
                # hidden d_hidden x d_hidden layers on the MXU (weights pre-cast).
                for wl, bl in zip(w_hidden, b_hidden):
                    h = jnp.dot(wl, h.astype(compute_dtype),
                                preferred_element_type=jnp.float32) + bl
                    h = jnp.maximum(h, 0.0)
                # output layer (d_out = 3) on the VPU: broadcast-mul + sublane
                # reduce per output channel instead of a 3-row MXU pass.
                rows = [jnp.sum(w_last[:, j:j + 1] * h, axis=0, keepdims=True)
                        for j in range(3)]
                z = jnp.concatenate(rows, axis=0) + b_last       # (3, width)
            y = 0.5 * (jnp.tanh(0.5 * z) + 1.0)                  # Sigmoid via EUP tanh
            o_ref[:, pl.ds(c0, width)] = y.astype(o_ref.dtype)

        # Fully-unrolled static sub-tile loop over the pixel (lane) axis: the
        # (d_hidden, sub) activations stay in vregs instead of spilling a whole
        # (d_hidden, tile_cols) slab through VMEM every layer.
        for s in range(n_sub):
            process(s * sub, sub)
        if rem:                                                  # rem is a static
            process(n_sub * sub, rem)                            # multiple of 128

    return kernel


def tonemap_mlp(rgb_hdr, params, tile_cols=16384, sub_cols=512,
                compute_dtype=jnp.bfloat16):
    """params: list of (W, b) with W[l] shaped (d_in, d_out), b[l] shaped (d_out,).

    Channel-major compute ((3, N) / (d_hidden, N)): the pixel axis sits on the
    128-lane dimension -> lane-dense loads/stores and full MXU N-width.  The
    single XLA transpose on each side is cheaper than pixel-major (tc, 3)
    blocks, whose DMAs would move 12-byte lines and pad 3 -> 128 lanes in VMEM.
    """
    orig_shape = rgb_hdr.shape
    assert orig_shape[-1] == 3
    x2 = rgb_hdr.reshape(-1, 3)
    n = x2.shape[0]
    xt = x2.T                                    # (3, N): layout plumbing only

    # Large column tiles (per-step overhead ~0.35us); >=2 grid steps so v7x's
    # two TensorCores both get work; tc is a multiple of 128 when tc < n.
    if n > 256:
        tc = min(tile_cols, ((pl.cdiv(n, 2) + 127) // 128) * 128)
    else:
        tc = n
    grid = (pl.cdiv(n, tc),)                     # partial last block is clipped

    n_layers = len(params)
    in_specs = [pl.BlockSpec((3, tc), lambda i: (0, i))]
    args = [xt]
    for layer, (w, b) in enumerate(params):
        w = jnp.asarray(w)
        b = jnp.asarray(b)
        if layer == 0:
            wk = w.T.astype(jnp.float32)         # (d_out0, 3): VPU layer, f32
        elif layer == n_layers - 1:
            wk = w.astype(jnp.float32)           # (d_hidden, 3): VPU out layer, f32
        else:
            wk = w.T.astype(compute_dtype)       # (d_out, d_in): MXU, pre-cast
        bk = b.astype(jnp.float32).reshape(-1, 1)
        in_specs.append(pl.BlockSpec(wk.shape, lambda i: (0, 0)))  # resident
        in_specs.append(pl.BlockSpec(bk.shape, lambda i: (0, 0)))  # resident
        args += [wk, bk]

    out = pl.pallas_call(
        _make_mlp_kernel(n_layers, min(sub_cols, tc), compute_dtype),
        out_shape=jax.ShapeDtypeStruct((3, n), rgb_hdr.dtype),
        grid=grid,
        in_specs=in_specs,
        out_specs=pl.BlockSpec((3, tc), lambda i: (0, i)),
        compiler_params=pltpu.CompilerParams(dimension_semantics=("parallel",)),
    )(*args)
    return out.T.reshape(orig_shape)


# ----------------------------------------------------------------------------
# deterministic parameter init (mimics torch.nn.Linear default: U(-1/sqrt(fan_in), +))
# ----------------------------------------------------------------------------
def init_mlp_params(key, n_layers, d_hidden, d_input=3, d_output=3):
    dims = [d_input] + [d_hidden] * (n_layers - 1) + [d_output]
    params = []
    for layer in range(n_layers):
        key, kw, kb = jax.random.split(key, 3)
        bound = 1.0 / jnp.sqrt(jnp.float32(dims[layer]))
        w = jax.random.uniform(kw, (dims[layer], dims[layer + 1]), jnp.float32,
                               minval=-bound, maxval=bound)
        b = jax.random.uniform(kb, (dims[layer + 1],), jnp.float32,
                               minval=-bound, maxval=bound)
        params.append((w, b))
    return params


# ----------------------------------------------------------------------------
# pure-JAX references for correctness check
# ----------------------------------------------------------------------------
def _ref_gamma(x, gamma):
    return (x / (x + 1.0)) ** gamma


def _ref_mlp(x, params):
    h = x.reshape(-1, 3)
    n_layers = len(params)
    for layer, (w, b) in enumerate(params):
        h = jnp.dot(h, w, precision=jax.lax.Precision.HIGHEST) + b
        h = jnp.maximum(h, 0.0) if layer < n_layers - 1 else jax.nn.sigmoid(h)
    return h.reshape(x.shape)


if __name__ == "__main__":
    key = jax.random.PRNGKey(0)
    k_in, k_par = jax.random.split(key)

    # small HDR image batch: [B, H, W, 3] (512 pixels)
    rgb_hdr = jax.random.uniform(k_in, (2, 16, 16, 3), jnp.float32) * 4.0

    # mode = 'fixed-gamma' (gamma baked in as a compile-time constant)
    gamma = 2.2
    out_fixed = jax.block_until_ready(tonemap_gamma(rgb_hdr, gamma))
    assert out_fixed.shape == rgb_hdr.shape
    assert jnp.allclose(out_fixed, _ref_gamma(rgb_hdr, gamma), atol=1e-5, rtol=1e-5)

    # mode = 'learned-gamma' (gamma as a 1-D SMEM scalar operand)
    gamma_param = jnp.asarray([2.2], jnp.float32)
    out_learn = jax.block_until_ready(tonemap_gamma(rgb_hdr, gamma_param))
    assert jnp.allclose(out_learn, _ref_gamma(rgb_hdr, 2.2), atol=1e-5, rtol=1e-5)

    # mode = 'learned-mlp' with n_layers=3, d_hidden=32
    params = init_mlp_params(k_par, n_layers=3, d_hidden=32)
    ref = _ref_mlp(rgb_hdr, params)

    # f32 MXU path (tight-ish tolerance)
    out_mlp_f32 = jax.block_until_ready(
        tonemap_mlp(rgb_hdr, params, compute_dtype=jnp.float32))
    assert out_mlp_f32.shape == rgb_hdr.shape
    assert jnp.allclose(out_mlp_f32, ref, atol=5e-3, rtol=0)

    # default bf16 MXU path (looser tolerance; sigmoid output is in [0, 1])
    out_mlp_bf16 = jax.block_until_ready(tonemap_mlp(rgb_hdr, params))
    assert jnp.allclose(out_mlp_bf16, ref, atol=5e-2, rtol=0)

    print("KERNEL_OK")
</pallas_src>

<mosaic_0001>
module attributes {stable_mosaic.version = 11 : i64} {
  func.func @_gamma_kernel_static(%arg0: i32, %arg1: memref<8x128xf32, #tpu.memory_space<vmem>>, %arg2: memref<8x128xf32, #tpu.memory_space<vmem>>) attributes {dimension_semantics = [#tpu.dimension_semantics<parallel>], iteration_bounds = array<i64: 2>, scalar_prefetch = 0 : i64, scratch_operands = 0 : i64, tpu.core_type = #tpu.core_type<tc>, window_params = [{transform_indices = @transform_0, window_bounds = array<i64: 8, 128>}, {transform_indices = @transform_1, window_bounds = array<i64: 8, 128>}]} {
    %c0 = arith.constant 0 : index
    %c0_0 = arith.constant 0 : index
    %0 = vector.load %arg1[%c0, %c0_0] : memref<8x128xf32, #tpu.memory_space<vmem>>, vector<8x128xf32>
    %cst = arith.constant 1.000000e+00 : f32
    %1 = vector.broadcast %cst : f32 to vector<8x128xf32>
    %2 = arith.addf %0, %1 : vector<8x128xf32>
    %3 = arith.divf %0, %2 : vector<8x128xf32>
    %cst_1 = arith.constant 1.000000e-30 : f32
    %4 = vector.broadcast %cst_1 : f32 to vector<8x128xf32>
    %5 = arith.addf %3, %4 : vector<8x128xf32>
    %6 = math.log %5 : vector<8x128xf32>
    %cst_2 = arith.constant 2.200000e+00 : f32
    %7 = vector.broadcast %cst_2 : f32 to vector<8x128xf32>
    %8 = arith.mulf %7, %6 : vector<8x128xf32>
    %9 = math.exp %8 : vector<8x128xf32>
    %c0_3 = arith.constant 0 : index
    %c0_4 = arith.constant 0 : index
    %10 = vector.load %arg2[%c0_3, %c0_4] : memref<8x128xf32, #tpu.memory_space<vmem>>, vector<8x128xf32>
    tpu.vector_store %arg2[%c0_3, %c0_4], %9 {strides = array<i32>} : memref<8x128xf32, #tpu.memory_space<vmem>>, vector<8x128xf32>,
    return
  }
  func.func @transform_0(%arg0: i32) -> (i32, i32) {
    %c0_i32 = arith.constant 0 : i32
    %c0_i32_0 = arith.constant 0 : i32
    return %arg0, %c0_i32 : i32, i32
  }
  func.func @transform_1(%arg0: i32) -> (i32, i32) {
    %c0_i32 = arith.constant 0 : i32
    %c0_i32_0 = arith.constant 0 : i32
    return %arg0, %c0_i32 : i32, i32
  }
}

</mosaic_0001>

<bundles_post_ra>
// kernel: tpu_custom_call.1
= control target key start
LH: loop header
LB: loop body
LE: loop exit
PB: predicated region body
PF: predicated region fallthrough
CT: control target
= control target key end

     0   :  { %6 = vsyncpa [#allocation3], 0  ;;  %s547_s0 = inlined_call_operand.hbm [shape: f32[12,128], index: 0, kind: input, shape index: {}]   ;;  %s548_s1 = inlined_call_operand.hbm [shape: f32[12,128], index: 1, kind: output, shape index: {}]  }
   0x1   :  { %8 = vsyncpa [#allocation3 + $0x1], 0 }
   0x2   :  { %9 = vsyncpa [#allocation4], 0 }
   0x3   :  { %11 = vsyncpa [#allocation4 + $0x1], 0  ;;  %s416_s6 = smov 0   ;;  %s418_s7 = smov 0  }
   0x4   :  { %s420_s8 = smov 0   ;;  %s422_s9 = smov 0  }
   0x5 LB: > { %s437_s10 = sadd.s32 4294967295, %s404_s9   ;;  %s244_s11 = sadd.s32 4294967294, %s404_s9   ;;  %s404_s9 = sphi %s422_s9, %s558_s9   ;;  %s400_s8 = sphi %s420_s8, %s557_s8   ;;  %s396_s7 = sphi %s418_s7, %s556_s7   ;;  %s392_s6 = sphi %s416_s6, %s555_s6  }
   0x6   : > { %s441_s12 = sadd.s32 1, %s404_s9   ;;  %s24_s13 = sadd.s32 1, %s400_s8 }
   0x7   : > { %s21_s14 = ssub.s32 %s404_s9, %s441_s12  ;;  %p31_p0 = scmp.ne.s32.totalorder %s400_s8, %s396_s7 }
   0x8   : > { %p22_p1 = scmp.eq.s32.totalorder %s21_s14, 0  ;;  %p32_p2 = scmp.eq.s32.totalorder %s404_s9, 0 }
   0x9   : > { %p37_p3 = scmp.ne.s32.totalorder %s396_s7, %s392_s6  ;;  %p38_p4 = scmp.eq.s32.totalorder %s437_s10, 0 }
   0xa   : > { %s453_s15 = scalar_select %p22_p1, %s400_s8, %s24_s13  }
   0xb   : > { %p455_p5 = por %p32_p2, %p31_p0  ;;  %p459_p6 = por %p38_p4, %p37_p3 }
   0xc   : > { %p61_p7 = scmp.eq.s32.totalorder %s437_s10, 1  ;;  %p67_p8 = scmp.eq.s32.totalorder %s244_s11, 1 }
   0xd   : > { %p268_p10 = scmp.lt.s32.totalorder %s404_s9, 2  ;;  %s87_s20 = sand.u32 1, %s400_s8  }
   0xe   : > { %p466_p11 = por %p61_p7, %p31_p0  ;;  %p470_p12 = por %p67_p8, %p37_p3 }
   0xf   : > { %s248_s21 = sshll.u32 %s404_s9, 3  ;;  %s247_s22 = sshll.u32 %s87_s20, 3 }
  0x10   : > { %s95_s25 = scalar_lea.hbm %s547_s0, %s248_s21  ;;  %s91_s27 = scalar_lea.vmem [#allocation2], %s247_s22 }
  0x11   : > { %s97_s26 = sshll.u32 %s95_s25, 4  ;;  %s99_s28 = sshll.u32 %s91_s27, 4  ;;  %s98_s26 = int_to_ptr.hbm [resolvable:$true] %s97_s26  ;;  %s100_s28 = int_to_ptr.vmem [resolvable:$true] %s99_s28 }
  0x12   : > { %p481_p13 = pnand %p268_p10, %p455_p5  ;;  %p249_p0 = scmp.ge.s32.totalorder %s404_s9, 1 }
  0x13   : > { %p104_p1 = scmp.lt.s32.totalorder %s404_s9, 3  ;;  %s88_s30 = scalar_lea.sflag [#allocation3], %s87_s20 }
  0x14   : > { %s308_s2 = sshra.s32 %s98_s26, 4  ;;  %p312_p3 = pneg %p481_p13  ;;  %s309_s2 = int_to_ptr.hbm [resolvable:$true] %s308_s2 }
  0x15   : > { %s310_s3 = scalar_lea.hbm %s309_s2, 8  ;;  %s315_s11 = scalar_lea.hbm %s547_s0, 16 }
  0x16   : > { %p311_p2 = scmp.ne.s32.totalorder %s309_s2, %s310_s3  ;;  %p316_p5 = scmp.lt.s32.totalorder %s309_s2, %s547_s0 }
  0x17   : > { %p317_p8 = scmp.lt.s32.totalorder %s315_s11, %s310_s3 }
  0x18   : > { %p313_p4 = pnand %p312_p3, %p311_p2 }
  0x19   : > { %p318_p10 = por %p317_p8, %p316_p5 }
  0x1a   : > { %p314_p7 = pneg %p313_p4 }
  0x1c   : > { %p319_p9 = pnand %p318_p10, %p314_p7 }
  0x1e   : > { %322 = shalt.err (!%p319_p9)
}
  0x1f   : > { %263 = dma.hbm_to_vmem [thread:$0]  (!%p481_p13), %s98_s26, 128, %s100_s28, %s88_s30  }
  0x20   : > { %p105_p2 = pnand %p249_p0, %p104_p1 }
  0x21   : > { %s502_s16 = sand.u32 (!%p105_p2), 1, %s396_s7  }
  0x22   : > { %108 = sbr.rel (%p105_p2) target bundleno = 87 (0x57), region = 24  ;;  %s250_s20 = sshll.u32 (!%p105_p2), %s502_s16, 3 }
  0x23   : > { %s111_s21 = scalar_lea.sflag (!%p105_p2), [#allocation3], %s502_s16  ;;  %s114_s22 = scalar_lea.vmem (!%p105_p2), [#allocation2], %s250_s20 }
  0x27   : > { %383 = dma.done.wait (%p459_p6), %s111_s21, 128  }
  0x28   : > { %385 = vsyncadd (%p459_p6), %s111_s21, 4294967168  ;;  %v134_v0 = vld [vmem:[%s114_s22] sm:$0xff]  ;;  %s253_s17 = sshll.u32 %s437_s10, 3  ;;  %s133_s26 = scalar_lea.vmem [#allocation5], %s250_s20 }
  0x29   : > { %v135_v1 = vadd.f32 1.0, %v134_v0  ;;  %s169_s25 = scalar_lea.hbm %s548_s1, %s253_s17  ;;  %s171_s27 = sshll.u32 %s133_s26, 4  ;;  %s172_s27 = int_to_ptr.vmem [resolvable:$true] %s171_s27 }
  0x2a   : > { %s173_s28 = sshll.u32 %s169_s25, 4  ;;  %s159_s29 = scalar_lea.sflag [#allocation4], %s502_s16  ;;  %s174_s28 = int_to_ptr.hbm [resolvable:$true] %s173_s28 }
  0x2b   : > { %302 = vrcp.f32 %v135_v1  ;;  %v147_v4 = vand.u32 2147483648, %v135_v1  ;;  %vm141_vm0 = vweird.f32 %v135_v1  ;;  %v145_v6 = vand.u32 2147483647, %v135_v1  ;;  %s352_s30 = sshra.s32 %s174_s28, 4  ;;  %s358_s4 = scalar_lea.hbm %s548_s1, 16  ;;  %s353_s30 = int_to_ptr.hbm [resolvable:$true] %s352_s30 }
  0x2c   : > { %s354_s2 = scalar_lea.hbm %s353_s30, 8  ;;  %p359_p0 = scmp.lt.s32.totalorder %s353_s30, %s548_s1 }
  0x2d   : > { %v148_v8 = vor.u32 1.1754944e-38, %v147_v4  ;;  %vm146_vm3 = vcmp.eq.f32.partialorder %v145_v6, 8.507059e+37  ;;  %p355_p6 = scmp.ne.s32.totalorder %s353_s30, %s354_s2  ;;  %p360_p1 = scmp.lt.s32.totalorder %s358_s4, %s354_s2 }
  0x2f   : > { %p356_p9 = pnand %p355_p6, %p466_p11  ;;  %p361_p3 = por %p360_p1, %p359_p0 }
  0x31   : > { %v303_v2 = vpop.eup %302  ;;  %p357_p13 = pneg %p356_p9 }
  0x32   : > { %v137_v3 = vmul.f32 %v303_v2, %v135_v1  ;;  %vm142_vm1 = vweird.f32 %v303_v2 }
  0x33   : > { %vm143_vm2 = vmor %vm141_vm0, %vm142_vm1  ;;  %p362_p4 = pnand %p361_p3, %p357_p13 }
  0x34   : > { %v138_v5 = vsub.f32 1.0, %v137_v3 }
  0x36   : > { %v139_v7 = vmul.f32 %v303_v2, %v138_v5 }
  0x38   : > { %v140_v9 = vadd.f32 %v303_v2, %v139_v7 }
  0x3a   : > { %v144_v10 = vsel %vm143_vm2, %v303_v2, %v140_v9 }
  0x3b   : > { %v149_v11 = vsel %vm146_vm3, %v148_v8, %v144_v10 }
  0x3c   : > { %v150_v12 = vmul.f32 %v149_v11, %v134_v0 }
  0x3e   : > { %v151_v13 = vadd.f32 1e-30, %v150_v12 }
  0x40   : > { %304 = vlog2.f32 %v151_v13 }
  0x46   : > { %v305_v14 = vpop.eup %304 }
  0x47   : > { %v153_v15 = vmul.f32 0.6931472, %v305_v14 }
  0x49   : > { %v154_v16 = vmul.f32 2.2, %v153_v15 }
  0x4b   : > { %v155_v17 = vmul.f32 1.442695, %v154_v16 }
  0x4d   : > { %306 = vpow2.f32 %v155_v17 }
  0x53   : > { %v307_v18 = vpop.eup %306 }
  0x54   : > { %157 = vst [vmem:[%s133_s26] sm:$0xff] %v307_v18 }
  0x55   : > { %365 = shalt.err (!%p362_p4)
}
  0x56   : > { %258 = dma.vmem_to_hbm [thread:$0]  (%p466_p11), %s172_s27, 128, %s174_s28, %s159_s29  }
  0x57 PF: > { %s185_s13 = sand.u32 1, %s392_s6   ;;  %p554_p7 = scmp.ge.s32.totalorder %s404_s9, 2 }
  0x58   : > { %s186_s14 = scalar_lea.sflag [#allocation4], %s185_s13 }
  0x59   : > { %p265_p5 = pnand %p554_p7, %p470_p12 }
  0x5b   : > { %p266_p8 = pneg %p265_p5 }
  0x5d   : > { %387 = dma.done.wait (%p266_p8), %s186_s14, 128  }
  0x5e   : > { %389 = vsyncadd (%p266_p8), %s186_s14, 4294967168  ;;  %p14_p10 = scmp.ge.s32.totalorder %s441_s12, 4   ;;  %s555_s6 = smov %s396_s7 }
  0x5f   : > { %s556_s7 = smov %s400_s8  ;;  %s557_s8 = smov %s453_s15 }
  0x60   : > { %s558_s9 = smov %s441_s12  ;;  %16 = sbr.rel (!%p14_p10) target bundleno = 5 (0x5), region = 69 }
  0x65   :  { %192 = vsyncpa [#allocation3], 1 }
  0x66   :  { %194 = vsyncpa [#allocation3 + $0x1], 1 }
  0x67   :  { %195 = vsyncpa [#allocation4], 1 }
  0x68   :  { %197 = vsyncpa [#allocation4 + $0x1], 1 }

</bundles_post_ra>
